<compile_context>
chip_gen: v5e
topology: v5e:2x2
jax: 0.10.0
libtpu: 0.0.40
codegen_flags: <defaults>
</compile_context>

<pallas_src>
import functools

import jax
import jax.numpy as jnp
from jax.experimental import pallas as pl
from jax.experimental.pallas import tpu as pltpu

_SQRT_2_OVER_PI = 0.7978845608028654
_GELU_C2 = 0.044715 * _SQRT_2_OVER_PI


def _gelu_tanh(x):
    # Matches torch.nn.functional.gelu(x, approximate='tanh').
    # Polynomial factored as x*(c1 + c2*x*x) to save one multiply.
    c1 = jnp.asarray(_SQRT_2_OVER_PI, dtype=x.dtype)
    c2 = jnp.asarray(_GELU_C2, dtype=x.dtype)
    half = jnp.asarray(0.5, dtype=x.dtype)
    one = jnp.asarray(1.0, dtype=x.dtype)
    inner = x * (c1 + c2 * x * x)
    return half * x * (one + jnp.tanh(inner))


def _apply_gelu(h_f32, w2_dtype, gelu_low_precision):
    if gelu_low_precision and w2_dtype == jnp.bfloat16:
        # v6e/v7x: bf16 GELU halves VPU/EUP pressure and fuses the FC2 downcast.
        # TODO(synk): keep f32 GELU on v5e (no bf16 VPU/EUP there) via
        #             gelu_in_low_precision=False.
        return _gelu_tanh(h_f32.astype(jnp.bfloat16))
    return _gelu_tanh(h_f32)


def _mlp_kernel_tiled(x_ref, w1_ref, b1_ref, w2_ref, b2_ref, o_ref, acc_ref,
                      *, gelu_low_precision):
    # I-tiled reduction path.
    #   x_ref: (tm, H)  w1_ref: (H, ti)  b1_ref: (1, ti)
    #   w2_ref: (ti, H) b2_ref: (1, H)   o_ref: (tm, H)
    #   acc_ref: (tm, H) f32 scratch, resident across the I axis.
    k = pl.program_id(1)

    @pl.when(k == 0)
    def _init():
        # Fold the FC2 bias into the accumulator init.
        acc_ref[...] = jnp.broadcast_to(
            b2_ref[...].astype(jnp.float32), acc_ref.shape)

    # FC1 chunk: native-dtype operands, f32 accumulation on the MXU.
    h = jnp.dot(x_ref[...], w1_ref[...], preferred_element_type=jnp.float32)
    h = h + b1_ref[...].astype(jnp.float32)

    h = _apply_gelu(h, w2_ref.dtype, gelu_low_precision)

    # Partial FC2: match weight dtype on the MXU, accumulate in f32.
    acc_ref[...] += jnp.dot(h.astype(w2_ref.dtype), w2_ref[...],
                            preferred_element_type=jnp.float32)

    @pl.when(k == pl.num_programs(1) - 1)
    def _finalize():
        o_ref[...] = acc_ref[...].astype(o_ref.dtype)


def _mlp_kernel_resident(x_ref, w1_ref, b1_ref, w2_ref, b2_ref, o_ref,
                         *, gelu_low_precision):
    # Weight-resident path (single I step): no scratch, no init/finalize.
    h = jnp.dot(x_ref[...], w1_ref[...], preferred_element_type=jnp.float32)
    h = h + b1_ref[...].astype(jnp.float32)
    h = _apply_gelu(h, w2_ref.dtype, gelu_low_precision)
    out = jnp.dot(h.astype(w2_ref.dtype), w2_ref[...],
                  preferred_element_type=jnp.float32)
    out = out + b2_ref[...].astype(jnp.float32)
    o_ref[...] = out.astype(o_ref.dtype)


def _round_up(x, m):
    return ((x + m - 1) // m) * m


def _pick_tm(M, tm_req):
    """Row tile: MXU-saturating; multiple of 256 for large problems (v7x MXU),
    preferring an EVEN number of M tiles (v7x has 2 TensorCores on the
    'parallel' axis); a single 8-aligned tile for tiny problems."""
    M8 = _round_up(M, 8)
    if M8 <= max(tm_req, 8):
        return M8                      # one tile covers everything
    if tm_req < 256:
        return min(_round_up(tm_req, 8), M8)
    base = _round_up(tm_req, 256)
    cands = sorted({base, max(256, (base // 2) // 256 * 256), base * 2})
    best_key, best_tm = None, base
    for cand in cands:
        n = pl.cdiv(M, cand)
        key = (n % 2, -cand)           # prefer even tile count, then larger tile
        if best_key is None or key < best_key:
            best_key, best_tm = key, cand
    return best_tm


def siglip_mlp(hidden_states, w1, b1, w2, b2, *, tm=512, ti=512,
               compute_dtype=None, gelu_in_low_precision=True,
               vmem_limit_bytes=48 * 1024 * 1024):
    """SiglipMLP forward: (x @ W1 + b1) -> tanh-GELU -> (@ W2 + b2).

    hidden_states: (B, S, H); w1: (H, I); b1: (I,); w2: (I, H); b2: (H,).
    compute_dtype: optionally cast x/W1/W2 (e.g. jnp.bfloat16) for the fast
      MXU path; biases and accumulation stay f32.
    ti >= I selects the weight-resident path (weights DMA'd once); pair with a
      larger vmem_limit_bytes on v5e/v6e (128 MiB physical VMEM).  The default
      tiled path (~<48 MiB) is safe on v7x (64 MiB physical).
    """
    B, S, H = hidden_states.shape
    I = w1.shape[1]
    M = B * S
    out_dtype = hidden_states.dtype

    if compute_dtype is not None:
        hidden_states = hidden_states.astype(compute_dtype)
        w1 = w1.astype(compute_dtype)
        w2 = w2.astype(compute_dtype)

    tm = _pick_tm(M, tm)
    m_tiles = pl.cdiv(M, tm)   # edge row block is masked by Pallas (no pad/slice)

    # Intermediate (reduction) axis: lane-aligned tile.  Zero-padding here is
    # exact (gelu(0)=0 and the padded W2 rows are zero) and only triggers when
    # I is not tile-divisible.
    # TODO(synk): pre-pad / pre-transpose weights once at model-load time so
    # this per-call weight pad disappears for awkward intermediate sizes.
    ti = min(ti, _round_up(I, 128))
    I_pad = _round_up(I, ti)
    if I_pad != I:
        w1 = jnp.pad(w1, ((0, 0), (0, I_pad - I)))
        b1 = jnp.pad(b1, ((0, I_pad - I),))
        w2 = jnp.pad(w2, ((0, I_pad - I), (0, 0)))
    n_k = I_pad // ti

    x2d = hidden_states.reshape(M, H)          # metadata-only reshape
    b1_2d = b1.reshape(1, I_pad)
    b2_2d = b2.reshape(1, H)

    if n_k == 1:
        # Weight-resident: constant index maps -> W1/W2/biases DMA'd once and
        # kept in VMEM for every row tile; no accumulator scratch needed.
        kernel = functools.partial(_mlp_kernel_resident,
                                   gelu_low_precision=gelu_in_low_precision)
        grid_spec = pltpu.PrefetchScalarGridSpec(
            num_scalar_prefetch=0,
            grid=(m_tiles,),
            in_specs=[
                pl.BlockSpec((tm, H), lambda i: (i, 0)),       # x row tile
                pl.BlockSpec((H, I_pad), lambda i: (0, 0)),    # W1 (resident)
                pl.BlockSpec((1, I_pad), lambda i: (0, 0)),    # b1 (resident)
                pl.BlockSpec((I_pad, H), lambda i: (0, 0)),    # W2 (resident)
                pl.BlockSpec((1, H), lambda i: (0, 0)),        # b2 (resident)
            ],
            out_specs=pl.BlockSpec((tm, H), lambda i: (i, 0)),
        )
        dim_sem = ("parallel",)
    else:
        kernel = functools.partial(_mlp_kernel_tiled,
                                   gelu_low_precision=gelu_in_low_precision)
        grid_spec = pltpu.PrefetchScalarGridSpec(
            num_scalar_prefetch=0,
            grid=(m_tiles, n_k),
            in_specs=[
                pl.BlockSpec((tm, H), lambda i, k: (i, 0)),    # x row tile
                pl.BlockSpec((H, ti), lambda i, k: (0, k)),    # W1 I-chunk
                pl.BlockSpec((1, ti), lambda i, k: (0, k)),    # b1 I-chunk
                pl.BlockSpec((ti, H), lambda i, k: (k, 0)),    # W2 I-chunk
                pl.BlockSpec((1, H), lambda i, k: (0, 0)),     # b2
            ],
            out_specs=pl.BlockSpec((tm, H), lambda i, k: (i, 0)),
            scratch_shapes=[pltpu.VMEM((tm, H), jnp.float32)],
        )
        dim_sem = ("parallel", "arbitrary")

    out2d = pl.pallas_call(
        kernel,
        out_shape=jax.ShapeDtypeStruct((M, H), out_dtype),
        grid_spec=grid_spec,
        compiler_params=pltpu.CompilerParams(
            dimension_semantics=dim_sem,
            # v7x has only 64 MiB physical VMEM per TC -- leave headroom.
            vmem_limit_bytes=vmem_limit_bytes,
        ),
    )(x2d, w1, b1_2d, w2, b2_2d)

    return out2d.reshape(B, S, H)


def _reference(x, w1, b1, w2, b2):
    B, S, H = x.shape
    h = x.reshape(-1, H).astype(jnp.float32) @ w1.astype(jnp.float32) + b1
    h = _gelu_tanh(h)
    out = h @ w2.astype(jnp.float32) + b2
    return out.reshape(B, S, H)


if __name__ == "__main__":
    key = jax.random.PRNGKey(0)

    def make_inputs(B, S, H, I):
        k_x, k_w1, k_b1, k_w2, k_b2 = jax.random.split(key, 5)
        x = jax.random.normal(k_x, (B, S, H), dtype=jnp.float32)
        w1 = jax.random.uniform(k_w1, (H, I), dtype=jnp.float32,
                                minval=-1.0 / jnp.sqrt(H), maxval=1.0 / jnp.sqrt(H))
        b1 = jax.random.uniform(k_b1, (I,), dtype=jnp.float32,
                                minval=-1.0 / jnp.sqrt(H), maxval=1.0 / jnp.sqrt(H))
        w2 = jax.random.uniform(k_w2, (I, H), dtype=jnp.float32,
                                minval=-1.0 / jnp.sqrt(I), maxval=1.0 / jnp.sqrt(I))
        b2 = jax.random.uniform(k_b2, (H,), dtype=jnp.float32,
                                minval=-1.0 / jnp.sqrt(I), maxval=1.0 / jnp.sqrt(I))
        return x, w1, b1, w2, b2

    # Case 1: small module-consistent shapes (hidden=32, intermediate=128,
    # batch=2, seq=8) -> single-I-step, weight-resident path, f32.
    x, w1, b1, w2, b2 = make_inputs(2, 8, 32, 128)
    out = jax.block_until_ready(siglip_mlp(x, w1, b1, w2, b2))
    ref = _reference(x, w1, b1, w2, b2)
    assert jnp.allclose(out, ref, atol=1e-4, rtol=1e-4), "mismatch (resident, f32)"

    # Case 2: odd sequence length (edge row block masked, like real SigLIP
    # seq=729) + I tiled into 2 chunks -> exercises the accumulator path.
    x2, w1b, b1b, w2b, b2b = make_inputs(1, 9, 32, 256)
    out2 = jax.block_until_ready(siglip_mlp(x2, w1b, b1b, w2b, b2b, ti=128))
    ref2 = _reference(x2, w1b, b1b, w2b, b2b)
    assert jnp.allclose(out2, ref2, atol=1e-4, rtol=1e-4), "mismatch (tiled, f32)"

    # Case 3: bf16 operand path (fast MXU, bf16 GELU fused with FC2 downcast).
    out3 = jax.block_until_ready(
        siglip_mlp(x, w1, b1, w2, b2, compute_dtype=jnp.bfloat16))
    ref3 = _reference(x.astype(jnp.bfloat16), w1.astype(jnp.bfloat16), b1,
                      w2.astype(jnp.bfloat16), b2)
    assert jnp.allclose(out3.astype(jnp.float32), ref3, atol=2e-2, rtol=2e-2), \
        "mismatch (bf16)"

    print("KERNEL_OK")
</pallas_src>

<mosaic_0001>
module attributes {stable_mosaic.version = 11 : i64} {
  func.func @_mlp_kernel_resident(%arg0: i32, %arg1: memref<16x32xf32, #tpu.memory_space<vmem>>, %arg2: memref<32x128xf32, #tpu.memory_space<vmem>>, %arg3: memref<1x128xf32, #tpu.memory_space<vmem>>, %arg4: memref<128x32xf32, #tpu.memory_space<vmem>>, %arg5: memref<1x32xf32, #tpu.memory_space<vmem>>, %arg6: memref<16x32xf32, #tpu.memory_space<vmem>>) attributes {dimension_semantics = [#tpu.dimension_semantics<parallel>], iteration_bounds = array<i64: 1>, scalar_prefetch = 0 : i64, scratch_operands = 0 : i64, tpu.core_type = #tpu.core_type<tc>, window_params = [{transform_indices = @transform_0, window_bounds = array<i64: 16, 32>}, {pipeline_mode = #tpu.pipeline_mode<synchronous>, transform_indices = @transform_1, window_bounds = array<i64: 32, 128>}, {pipeline_mode = #tpu.pipeline_mode<synchronous>, transform_indices = @transform_2, window_bounds = array<i64: 1, 128>}, {pipeline_mode = #tpu.pipeline_mode<synchronous>, transform_indices = @transform_3, window_bounds = array<i64: 128, 32>}, {pipeline_mode = #tpu.pipeline_mode<synchronous>, transform_indices = @transform_4, window_bounds = array<i64: 1, 32>}, {transform_indices = @transform_5, window_bounds = array<i64: 16, 32>}]} {
    %c0 = arith.constant 0 : index
    %c0_0 = arith.constant 0 : index
    %0 = vector.load %arg1[%c0, %c0_0] : memref<16x32xf32, #tpu.memory_space<vmem>>, vector<16x32xf32>
    %c0_1 = arith.constant 0 : index
    %c0_2 = arith.constant 0 : index
    %1 = vector.load %arg2[%c0_1, %c0_2] : memref<32x128xf32, #tpu.memory_space<vmem>>, vector<32x128xf32>
    %cst = arith.constant dense<0.000000e+00> : vector<16x128xf32>
    %2 = tpu.matmul %0, %1, %cst {dimension_numbers = #tpu.dot_dimension_numbers<[1], [0], [0], [1], [0, 0, 1, 1], [], []>} : vector<16x32xf32>, vector<32x128xf32>, vector<16x128xf32> -> vector<16x128xf32>
    %c0_3 = arith.constant 0 : index
    %c0_4 = arith.constant 0 : index
    %3 = vector.load %arg3[%c0_3, %c0_4] : memref<1x128xf32, #tpu.memory_space<vmem>>, vector<1x128xf32>
    %4 = vector.broadcast %3 : vector<1x128xf32> to vector<16x128xf32>
    %5 = arith.addf %2, %4 : vector<16x128xf32>
    %cst_5 = arith.constant 0.0356774069 : f32
    %6 = vector.broadcast %cst_5 : f32 to vector<16x128xf32>
    %7 = arith.mulf %6, %5 : vector<16x128xf32>
    %8 = arith.mulf %7, %5 : vector<16x128xf32>
    %cst_6 = arith.constant 0.797884583 : f32
    %9 = vector.broadcast %cst_6 : f32 to vector<16x128xf32>
    %10 = arith.addf %9, %8 : vector<16x128xf32>
    %11 = arith.mulf %5, %10 : vector<16x128xf32>
    %cst_7 = arith.constant 5.000000e-01 : f32
    %12 = vector.broadcast %cst_7 : f32 to vector<16x128xf32>
    %13 = arith.mulf %12, %5 : vector<16x128xf32>
    %14 = math.tanh %11 : vector<16x128xf32>
    %cst_8 = arith.constant 1.000000e+00 : f32
    %15 = vector.broadcast %cst_8 : f32 to vector<16x128xf32>
    %16 = arith.addf %15, %14 : vector<16x128xf32>
    %17 = arith.mulf %13, %16 : vector<16x128xf32>
    %c0_9 = arith.constant 0 : index
    %c0_10 = arith.constant 0 : index
    %18 = vector.load %arg4[%c0_9, %c0_10] : memref<128x32xf32, #tpu.memory_space<vmem>>, vector<128x32xf32>
    %cst_11 = arith.constant dense<0.000000e+00> : vector<16x32xf32>
    %19 = tpu.matmul %17, %18, %cst_11 {dimension_numbers = #tpu.dot_dimension_numbers<[1], [0], [0], [1], [0, 0, 1, 1], [], []>} : vector<16x128xf32>, vector<128x32xf32>, vector<16x32xf32> -> vector<16x32xf32>
    %c0_12 = arith.constant 0 : index
    %c0_13 = arith.constant 0 : index
    %20 = vector.load %arg5[%c0_12, %c0_13] : memref<1x32xf32, #tpu.memory_space<vmem>>, vector<1x32xf32>
    %21 = vector.broadcast %20 : vector<1x32xf32> to vector<16x32xf32>
    %22 = arith.addf %19, %21 : vector<16x32xf32>
    %c0_14 = arith.constant 0 : index
    %c0_15 = arith.constant 0 : index
    %23 = vector.load %arg6[%c0_14, %c0_15] : memref<16x32xf32, #tpu.memory_space<vmem>>, vector<16x32xf32>
    tpu.vector_store %arg6[%c0_14, %c0_15], %22 {strides = array<i32>} : memref<16x32xf32, #tpu.memory_space<vmem>>, vector<16x32xf32>,
    return
  }
  func.func @transform_0(%arg0: i32) -> (i32, i32) {
    %c0_i32 = arith.constant 0 : i32
    %c0_i32_0 = arith.constant 0 : i32
    return %arg0, %c0_i32 : i32, i32
  }
  func.func @transform_1(%arg0: i32) -> (i32, i32) {
    %c0_i32 = arith.constant 0 : i32
    %c0_i32_0 = arith.constant 0 : i32
    %c0_i32_1 = arith.constant 0 : i32
    return %c0_i32, %c0_i32_0 : i32, i32
  }
  func.func @transform_2(%arg0: i32) -> (i32, i32) {
    %c0_i32 = arith.constant 0 : i32
    %c0_i32_0 = arith.constant 0 : i32
    %c0_i32_1 = arith.constant 0 : i32
    return %c0_i32, %c0_i32_0 : i32, i32
  }
  func.func @transform_3(%arg0: i32) -> (i32, i32) {
    %c0_i32 = arith.constant 0 : i32
    %c0_i32_0 = arith.constant 0 : i32
    %c0_i32_1 = arith.constant 0 : i32
    return %c0_i32, %c0_i32_0 : i32, i32
  }
  func.func @transform_4(%arg0: i32) -> (i32, i32) {
    %c0_i32 = arith.constant 0 : i32
    %c0_i32_0 = arith.constant 0 : i32
    %c0_i32_1 = arith.constant 0 : i32
    return %c0_i32, %c0_i32_0 : i32, i32
  }
  func.func @transform_5(%arg0: i32) -> (i32, i32) {
    %c0_i32 = arith.constant 0 : i32
    %c0_i32_0 = arith.constant 0 : i32
    return %arg0, %c0_i32 : i32, i32
  }
}

</mosaic_0001>

<bundles_post_ra>
// kernel: tpu_custom_call.1
= control target key start
LH: loop header
LB: loop body
LE: loop exit
PB: predicated region body
PF: predicated region fallthrough
CT: control target
= control target key end

     0   :  { %s305_s0 = inlined_call_operand.vmem [shape: f32[16,32], index: 0, kind: input, shape index: {}]   ;;  %s306_s1 = inlined_call_operand.vmem [shape: f32[32,128], index: 1, kind: input, shape index: {}]   ;;  %s307_s2 = inlined_call_operand.vmem [shape: f32[1,128], index: 2, kind: input, shape index: {}]   ;;  %s308_s3 = inlined_call_operand.vmem [shape: f32[128,32], index: 3, kind: input, shape index: {}]   ;;  %s309_s4 = inlined_call_operand.vmem [shape: f32[1,32], index: 4, kind: input, shape index: {}]   ;;  %s310_s5 = inlined_call_operand.hbm [shape: f32[16,32], index: 5, kind: output, shape index: {}]  }
   0x1   :  { %v26_v0 = vld [vmem:[%s306_s1 + $0x18] sm:$0xff]  ;;  %v25_v1 = vld [vmem:[%s306_s1 + $0x10] sm:$0xff]  ;;  %v24_v2 = vld [vmem:[%s306_s1 + $0x8] sm:$0xff] }
   0x2   :  { %50 = vmatpush.msra.mxu0 %v26_v0  ;;  %v92_v3 = vld [vmem:[%s308_s3 + $0x78] sm:$0xff]  ;;  %v91_v4 = vld [vmem:[%s308_s3 + $0x70] sm:$0xff]  ;;  %v23_v5 = vld [vmem:[%s306_s1] sm:$0xff] }
   0x3   :  { %97 = vmatpush.msra.mxu1 %v92_v3  ;;  %v90_v6 = vld [vmem:[%s308_s3 + $0x68] sm:$0xff]  ;;  %142 = vmatpush.msra.mxu2 %v92_v3 }
   0x4   :  { %51 = vmatpush.msra.mxu0 %v25_v1 }
   0x5   :  { %10 = vsyncpa [#allocation3], 0  ;;  %v21_v7 = vld [vmem:[%s305_s0] sm:$0xff]  ;;  %vm31_vm0 = vcmask 261120   ;;  %98 = vmatpush.msra.mxu1 %v91_v4  ;;  %143 = vmatpush.msra.mxu2 %v91_v4  ;;  %v88_v9 = vld [vmem:[%s308_s3 + $0x58] sm:$0xff]  ;;  %s193_s11 = smov [#allocation2]  }
   0x6   :  { %52 = vmatpush.msra.mxu0 %v24_v2  ;;  %v89_v8 = vld [vmem:[%s308_s3 + $0x60] sm:$0xff]  ;;  %v22_v10 = vld [vmem:[%s305_s0 + $0x8] sm:$0xff]  ;;  %v87_v11 = vld [vmem:[%s308_s3 + $0x50] sm:$0xff]  ;;  %s126_s12 = sshll.u32 %s193_s11, 4  ;;  %s128_s15 = sshll.u32 %s310_s5, 4  ;;  %s127_s12 = int_to_ptr.vmem [resolvable:$true] %s126_s12  ;;  %s129_s15 = int_to_ptr.hbm [resolvable:$true] %s128_s15 }
   0x7   :  { %99 = vmatpush.msra.mxu1 %v90_v6  ;;  %144 = vmatpush.msra.mxu2 %v90_v6  ;;  %v86_v12 = vld [vmem:[%s308_s3 + $0x48] sm:$0xff]  ;;  %v85_v13 = vld [vmem:[%s308_s3 + $0x40] sm:$0xff]  ;;  %v84_v14 = vld [vmem:[%s308_s3 + $0x38] sm:$0xff]  ;;  %s194_s16 = smov 128   ;;  %s195_s17 = smov 8  }
   0x8   :  { %53 = vmatpush.msra.mxu0 %v23_v5  ;;  %v83_v15 = vld [vmem:[%s308_s3 + $0x30] sm:$0xff]  ;;  %v82_v16 = vld [vmem:[%s308_s3 + $0x28] sm:$0xff]  ;;  %v81_v17 = vld [vmem:[%s308_s3 + $0x20] sm:$0xff] }
   0x9   :  { %140 = vmatmul.msk.f32.vlgmr.msra.gmra.mxu0 %vm31_vm0, %v21_v7  ;;  %100 = vmatpush.msra.mxu1 %v89_v8  ;;  %v80_v18 = vld [vmem:[%s308_s3 + $0x18] sm:$0xff]  ;;  %v79_v19 = vld [vmem:[%s308_s3 + $0x10] sm:$0xff]  ;;  %v78_v20 = vld [vmem:[%s308_s3 + $0x8] sm:$0xff] }
   0xa   :  { %145 = vmatpush.msra.mxu2 %v89_v8  ;;  %v77_v21 = vld [vmem:[%s308_s3] sm:$0xff] }
   0xb   :  { %101 = vmatpush.msra.mxu1 %v88_v9  ;;  %v161_v22 = vld [vmem:[%s307_s2] ss:$0 sm:$0xff] }
   0xc   :  { %146 = vmatpush.msra.mxu2 %v88_v9  ;;  %v162_v43 = vld [vmem:[%s309_s4] ss:$0 sm:$0xff] }
   0xd   :  { %102 = vmatpush.msra.mxu1 %v87_v11 }
   0xe   :  { %147 = vmatpush.msra.mxu2 %v87_v11 }
   0xf   :  { %103 = vmatpush.msra.mxu1 %v86_v12 }
  0x10   :  { %148 = vmatpush.msra.mxu2 %v86_v12 }
  0x11   :  { %141 = vmatmul.msk.f32.gmra.mxu0 %vm31_vm0, %v22_v10  ;;  %104 = vmatpush.msra.mxu1 %v85_v13 }
  0x12   :  { %149 = vmatpush.msra.mxu2 %v85_v13 }
  0x13   :  { %105 = vmatpush.msra.mxu1 %v84_v14 }
  0x14   :  { %150 = vmatpush.msra.mxu2 %v84_v14 }
  0x15   :  { %106 = vmatpush.msra.mxu1 %v83_v15 }
  0x16   :  { %151 = vmatpush.msra.mxu2 %v83_v15 }
  0x17   :  { %107 = vmatpush.msra.mxu1 %v82_v16 }
  0x18   :  { %152 = vmatpush.msra.mxu2 %v82_v16 }
  0x19   :  { %108 = vmatpush.msra.mxu1 %v81_v17 }
  0x1a   :  { %153 = vmatpush.msra.mxu2 %v81_v17 }
  0x1b   :  { %109 = vmatpush.msra.mxu1 %v80_v18 }
  0x1c   :  { %154 = vmatpush.msra.mxu2 %v80_v18 }
  0x1d   :  { %110 = vmatpush.msra.mxu1 %v79_v19 }
  0x1e   :  { %155 = vmatpush.msra.mxu2 %v79_v19 }
  0x1f   :  { %111 = vmatpush.msra.mxu1 %v78_v20 }
  0x20   :  { %156 = vmatpush.msra.mxu2 %v78_v20 }
  0x21   :  { %112 = vmatpush.msra.mxu1 %v77_v21 }
  0x22   :  { %157 = vmatpush.msra.mxu2 %v77_v21 }
  0x86   :  { %v55_v23 = vpop.f32.mrf.mxu0 }
  0x87   :  { %v56_v24 = vadd.f32 %v161_v22, %v55_v23 }
  0x89   :  { %v61_v25 = vmul.f32 0.035677407, %v56_v24  ;;  %v69_v36 = vmul.f32 0.5, %v56_v24 }
  0x8b   :  { %v63_v26 = vmul.f32 %v61_v25, %v56_v24 }
  0x8d   :  { %v65_v27 = vadd.f32 0.7978846, %v63_v26 }
  0x8e   :  { %v58_v28 = vpop.f32.mrf.mxu0 }
  0x8f   :  { %v59_v29 = vadd.f32 %v161_v22, %v58_v28  ;;  %v67_v30 = vmul.f32 %v65_v27, %v56_v24 }
  0x91   :  { %v62_v31 = vmul.f32 0.035677407, %v59_v29  ;;  %163 = vtanh.f32 %v67_v30  ;;  %v70_v40 = vmul.f32 0.5, %v59_v29 }
  0x93   :  { %v64_v32 = vmul.f32 %v62_v31, %v59_v29 }
  0x95   :  { %v66_v33 = vadd.f32 0.7978846, %v64_v32 }
  0x97   :  { %v164_v34 = vpop.eup %163  ;;  %v68_v35 = vmul.f32 %v66_v33, %v59_v29 }
  0x98   :  { %v73_v37 = vadd.f32 1.0, %v164_v34 }
  0x99   :  { %165 = vtanh.f32 %v68_v35 }
  0x9a   :  { %v75_v38 = vmul.f32 %v73_v37, %v69_v36 }
  0x9c   :  { %113 = vmatmul.f32.vlgmr.msra.gmra.mxu1 %v75_v38 }
  0x9f   :  { %v166_v39 = vpop.eup %165 }
  0xa0   :  { %v74_v41 = vadd.f32 1.0, %v166_v39 }
  0xa2   :  { %v76_v42 = vmul.f32 %v74_v41, %v70_v40 }
  0xa4   :  { %116 = vmatmul.f32.vlgmr.msra.gmra.mxu2 %v76_v42 }
 0x119   :  { %v114_v44 = vpop.f32.mrf.mxu1 }
 0x11a   :  { %v115_v45 = vadd.f32 %v162_v43, %v114_v44 }
 0x11c   :  { %120 = vst.msk [vmem:[#allocation2] sm:$0xff] %vm31_vm0, %v115_v45 }
 0x127   :  { %v117_v46 = vpop.f32.mrf.mxu2 }
 0x128   :  { %v118_v47 = vadd.f32 %v162_v43, %v117_v46 }
 0x12a   :  { %121 = vst.msk [vmem:[#allocation2 + $0x8] sm:$0xff] %vm31_vm0, %v118_v47 }
 0x12b   :  { %134 = dma.vmem_to_hbm [thread:$0]  %s127_s12, 256, %s129_s15, [#allocation3], %s194_s16, %s194_s16, %s195_s17  }
 0x12c   :  { %191 = dma.done.wait [#allocation3], 256  }
 0x12d   :  { %192 = vsyncadd [#allocation3], 4294967040 }
 0x12e   :  { %139 = vsyncpa [#allocation3], 1 }

</bundles_post_ra>
